<compile_context>
chip_gen: v5e
topology: v5e:2x2
jax: 0.10.0
libtpu: 0.0.40
codegen_flags: <defaults>
</compile_context>

<pallas_src>
import jax
import jax.numpy as jnp
import numpy as np
from jax.experimental import pallas as pl
from jax.experimental.pallas import tpu as pltpu


def _locked_dropout_kernel(x_ref, m_ref, o_ref):
    # m_ref is (tb, 1): one keep/drop value per row, broadcast across the
    # embedding (lane) dimension. Pure vld / vmul / vst.
    o_ref[...] = x_ref[...] * m_ref[...]


_SUBLANE_ALIGN = {4: 8, 2: 16, 1: 32}  # bytes-per-element -> sublane multiple


def _vmem_capacity_bytes() -> int:
    """Physical VMEM of the current chip; conservative fallback = v7x (64 MiB)."""
    try:
        info = pltpu.get_tpu_info()
        cap = getattr(info, "vmem_capacity_bytes", None)
        if cap:
            return int(cap)
    except Exception:
        pass
    return 64 * 1024 * 1024


def _round_down(x: int, m: int) -> int:
    return (x // m) * m


def _round_up(x: int, m: int) -> int:
    return ((x + m - 1) // m) * m


def _tile_plan(T: int, E: int, itemsize: int, align: int, budget: int):
    """Pick (tb, eb) maximizing tile size under `budget` bytes of VMEM.

    Footprint model: x is double-buffered and out is double-buffered
    (4 buffers of tb*eb*itemsize); the (tb, 1) mask buffers are negligible.
    """
    n_bufs = 4
    full_row_bytes = n_bufs * E * itemsize

    if align * full_row_bytes <= budget:
        # Full-extent E block: each row's DMA is fully contiguous.
        eb = E
        tb = _round_down(budget // full_row_bytes, align)
        if T > 2 * align:
            # Keep at least 2 row blocks so v7x's two TensorCores both work.
            half = _round_up(pl.cdiv(T, 2), align)
            tb = min(tb, half)
        if tb >= T:
            tb = T                       # full-extent block is always legal
        else:
            tb = max(align, _round_down(tb, align))
    else:
        # E too wide for a full-row slab under budget: tile the E axis too.
        tb = T if T <= 512 else max(align, _round_down(512, align))
        eb = _round_down(budget // (n_bufs * tb * itemsize), 128)
        eb = max(128, min(eb, E))
    return tb, eb


def proto_dropout(x, key, p=0.5):
    """Pallas implementation of ProtoDropout.forward. Returns (out, mask).

    mask: [1, T] in {0, 1}, same dtype as x.
    out:  x * mask[0][:, None]   (no inverted-dropout rescale, matching the
          reference module).
    """
    T, E = x.shape
    itemsize = jnp.dtype(x.dtype).itemsize
    align = _SUBLANE_ALIGN.get(itemsize, 8)

    # Tiny [1, T] Bernoulli mask — negligible work; generated with portable
    # JAX RNG in the wrapper so the Pallas body lowers everywhere.
    keep = jax.random.bernoulli(key, 1.0 - p, shape=(T,))
    mask_row = keep.astype(x.dtype).reshape(1, T)   # module's mask output
    mask_col = keep.astype(x.dtype).reshape(T, 1)   # broadcast layout for kernel

    capacity = _vmem_capacity_bytes()
    budget = int(0.65 * capacity)                   # tile footprint budget
    tb, eb = _tile_plan(T, E, itemsize, align, budget)

    # Row axis outer, E axis inner (mask block index constant across E steps).
    grid = (pl.cdiv(T, tb), pl.cdiv(E, eb))

    # x + out double buffers, plus the lane-padded (tb, 128) mask buffers.
    footprint = 4 * tb * eb * itemsize + 2 * tb * 128 * itemsize
    vmem_limit = min(int(0.85 * capacity),
                     max(32 * 1024 * 1024, footprint + 8 * 1024 * 1024))

    out = pl.pallas_call(
        _locked_dropout_kernel,
        out_shape=jax.ShapeDtypeStruct((T, E), x.dtype),
        grid=grid,
        in_specs=[
            pl.BlockSpec((tb, eb), lambda i, j: (i, j)),   # x tile
            pl.BlockSpec((tb, 1), lambda i, j: (i, 0)),    # per-row mask slice
        ],
        out_specs=pl.BlockSpec((tb, eb), lambda i, j: (i, j)),
        compiler_params=pltpu.CompilerParams(
            dimension_semantics=("parallel", "parallel"),
            vmem_limit_bytes=vmem_limit,
        ),
        cost_estimate=pl.CostEstimate(
            flops=T * E,
            transcendentals=0,
            bytes_accessed=(2 * T * E + 2 * T) * itemsize,
        ),
    )(x, mask_col)
    return out, mask_row


def _check(x, out, mask, T):
    x_np = np.asarray(x, dtype=np.float32)
    out_np = np.asarray(out, dtype=np.float32)
    mask_np = np.asarray(mask, dtype=np.float32)
    assert mask_np.shape == (1, T)
    assert np.all((mask_np == 0.0) | (mask_np == 1.0))
    np.testing.assert_allclose(out_np, x_np * mask_np[0][:, None], rtol=0, atol=0)


if __name__ == "__main__":
    p = 0.5
    key = jax.random.PRNGKey(0)
    k1, k2, k3, k4, k5, k6, k7, k8 = jax.random.split(key, 8)

    # Small shape consistent with the module: x is [type_length, embedding_size].
    T, E = 8, 32
    x = jax.random.normal(k1, (T, E), dtype=jnp.float32)
    out, mask = proto_dropout(x, k2, p=p)
    jax.block_until_ready((out, mask))
    _check(x, out, mask, T)

    # Larger case exercising the multi-row-block grid path.
    T2, E2 = 1024, 1024
    x2 = jax.random.normal(k3, (T2, E2), dtype=jnp.float32)
    out2, mask2 = proto_dropout(x2, k4, p=p)
    jax.block_until_ready((out2, mask2))
    _check(x2, out2, mask2, T2)

    # Ragged case: T not a multiple of 8, E < 128 (full-extent lane block,
    # partial last row block).
    T3, E3 = 100, 96
    x3 = jax.random.normal(k5, (T3, E3), dtype=jnp.float32)
    out3, mask3 = proto_dropout(x3, k6, p=p)
    jax.block_until_ready((out3, mask3))
    _check(x3, out3, mask3, T3)

    # bf16 case exercising the dtype-aware sublane alignment (align = 16).
    T4, E4 = 64, 256
    x4 = jax.random.normal(k7, (T4, E4), dtype=jnp.bfloat16)
    out4, mask4 = proto_dropout(x4, k8, p=p)
    jax.block_until_ready((out4, mask4))
    _check(x4, out4, mask4, T4)

    print("KERNEL_OK")
</pallas_src>

<mosaic_0001>
module attributes {stable_mosaic.version = 11 : i64} {
  func.func @_locked_dropout_kernel(%arg0: i32, %arg1: i32, %arg2: memref<8x32xf32, #tpu.memory_space<vmem>>, %arg3: memref<8x1xf32, #tpu.memory_space<vmem>>, %arg4: memref<8x32xf32, #tpu.memory_space<vmem>>) attributes {dimension_semantics = [#tpu.dimension_semantics<parallel>, #tpu.dimension_semantics<parallel>], iteration_bounds = array<i64: 1, 1>, scalar_prefetch = 0 : i64, scratch_operands = 0 : i64, tpu.core_type = #tpu.core_type<tc>, window_params = [{transform_indices = @transform_0, window_bounds = array<i64: 8, 32>}, {transform_indices = @transform_1, window_bounds = array<i64: 8, 1>}, {transform_indices = @transform_2, window_bounds = array<i64: 8, 32>}]} {
    %c0 = arith.constant 0 : index
    %c0_0 = arith.constant 0 : index
    %0 = vector.load %arg2[%c0, %c0_0] : memref<8x32xf32, #tpu.memory_space<vmem>>, vector<8x32xf32>
    %c0_1 = arith.constant 0 : index
    %c0_2 = arith.constant 0 : index
    %1 = vector.load %arg3[%c0_1, %c0_2] : memref<8x1xf32, #tpu.memory_space<vmem>>, vector<8x1xf32>
    %2 = vector.broadcast %1 : vector<8x1xf32> to vector<8x32xf32>
    %3 = arith.mulf %0, %2 : vector<8x32xf32>
    %c0_3 = arith.constant 0 : index
    %c0_4 = arith.constant 0 : index
    %4 = vector.load %arg4[%c0_3, %c0_4] : memref<8x32xf32, #tpu.memory_space<vmem>>, vector<8x32xf32>
    tpu.vector_store %arg4[%c0_3, %c0_4], %3 {strides = array<i32>} : memref<8x32xf32, #tpu.memory_space<vmem>>, vector<8x32xf32>,
    return
  }
  func.func @transform_0(%arg0: i32, %arg1: i32) -> (i32, i32) {
    %c0_i32 = arith.constant 0 : i32
    return %arg0, %arg1 : i32, i32
  }
  func.func @transform_1(%arg0: i32, %arg1: i32) -> (i32, i32) {
    %c0_i32 = arith.constant 0 : i32
    %c0_i32_0 = arith.constant 0 : i32
    return %arg0, %c0_i32 : i32, i32
  }
  func.func @transform_2(%arg0: i32, %arg1: i32) -> (i32, i32) {
    %c0_i32 = arith.constant 0 : i32
    return %arg0, %arg1 : i32, i32
  }
}

</mosaic_0001>

<bundles_post_ra>
// kernel: tpu_custom_call.1
= control target key start
LH: loop header
LB: loop body
LE: loop exit
PB: predicated region body
PF: predicated region fallthrough
CT: control target
= control target key end

     0   :  { %s93_s0 = inlined_call_operand.vmem [shape: f32[8,32], index: 0, kind: input, shape index: {}]   ;;  %s94_s1 = inlined_call_operand.vmem [shape: f32[8,1], index: 1, kind: input, shape index: {}]   ;;  %s95_s2 = inlined_call_operand.hbm [shape: f32[8,32], index: 2, kind: output, shape index: {}]  }
   0x1   :  { %v13_v0 = vld [vmem:[%s94_s1] sm:$0xff] }
   0x2   :  { %7 = vsyncpa [#allocation3], 0  ;;  %v67_v1 = vmov 0   ;;  %v12_v2 = vld [vmem:[%s93_s0] sm:$0xff]  ;;  %s68_s13 = smov [#allocation2]   ;;  %s29_s17 = sshll.u32 %s95_s2, 4  ;;  %s30_s17 = int_to_ptr.hbm [resolvable:$true] %s29_s17 }
   0x3   :  { %40 = vset.pattern.permute.xlu0 %v67_v1  ;;  %s27_s14 = sshll.u32 %s68_s13, 4  ;;  %vm20_vm0 = vcmask 261120   ;;  %s28_s14 = int_to_ptr.vmem [resolvable:$true] %s27_s14 }
   0x4   :  { %16 = vperm.xlu0 %40, %v13_v0  }
  0x76   :  { %v17_v3 = vpop.permute.xlu0 %16 }
  0x77   :  { %v19_v4 = vmul.f32 %v17_v3, %v12_v2 }
  0x79   :  { %21 = vst.msk [vmem:[#allocation2] sm:$0xff] %vm20_vm0, %v19_v4 }
  0x7a   :  { %32 = dma.vmem_to_hbm [thread:$0]  %s28_s14, 128, %s30_s17, [#allocation3]  }
  0x7b   :  { %65 = dma.done.wait [#allocation3], 128  }
  0x7c   :  { %66 = vsyncadd [#allocation3], 4294967168 }
  0x7d   :  { %37 = vsyncpa [#allocation3], 1 }

</bundles_post_ra>
